<compile_context>
chip_gen: v6e
topology: v6e:2x2x1
jax: 0.10.0
libtpu: 0.0.40
codegen_flags: <defaults>
</compile_context>

<pallas_src>
import math
from functools import partial

import jax
import jax.numpy as jnp
from jax.experimental import pallas as pl
from jax.experimental.pallas import tpu as pltpu


def _apply_activ(name, x):
    if name == 'relu':
        return jnp.maximum(x, 0.0)
    if name == 'tanh':
        return jnp.tanh(x)
    if name == 'silu':
        return x * jax.nn.sigmoid(x)
    if name == 'gelu':
        # torch.nn.GELU default is the exact (erf) formulation.
        return jax.nn.gelu(x, approximate=False)
    raise ValueError(f'Invalid activation function: {name}')


def fnn_kernel(x_ref, w_ref, b_ref, o_ref, *, activ):
    # x_ref: (TB, I)   row tile of the (padded) input
    # w_ref: (I, Hp)   W_ih^T, hidden dim zero-padded to a multiple of 128 lanes
    # b_ref: (1, Hp)   bias, same padding
    # o_ref: (TB, Hp)  lane-dense output tile
    y = jnp.dot(x_ref[...], w_ref[...], preferred_element_type=jnp.float32) + b_ref[...]
    o_ref[...] = _apply_activ(activ, y).astype(o_ref.dtype)


def _round_up(x, m):
    return (x + m - 1) // m * m


def fnn_forward(state, weight, bias, activ, *, block_rows=128):
    """activ(state @ weight.T + bias) via a single Pallas call.

    state : (B, I) or (I,) float32
    weight: (H, I) float32   (nn.Linear weight)
    bias  : (H,)   float32
    """
    squeeze = state.ndim == 1
    if squeeze:
        state = state[None, :]
    state = state.astype(jnp.float32)

    B, I = state.shape
    H = weight.shape[0]

    # Lane-dense output: pad hidden dim to a multiple of 128.
    Hp = _round_up(H, 128)
    # Sublane-aligned row tiles: pad batch to a multiple of the row tile.
    TB = min(block_rows, _round_up(B, 8))
    Bp = _round_up(B, TB)

    x_pad = jnp.pad(state, ((0, Bp - B), (0, 0)))
    w_pad = jnp.pad(weight.T.astype(jnp.float32), ((0, 0), (0, Hp - H)))   # (I, Hp)
    b_pad = jnp.pad(bias.astype(jnp.float32), (0, Hp - H))[None, :]        # (1, Hp)

    n_transc = 0 if activ == 'relu' else B * H
    cost = pl.CostEstimate(
        flops=2 * B * I * H,
        transcendentals=n_transc,
        bytes_accessed=4 * (B * I + I * H + H + B * H),
    )

    out = pl.pallas_call(
        partial(fnn_kernel, activ=activ),
        out_shape=jax.ShapeDtypeStruct((Bp, Hp), jnp.float32),
        grid=(Bp // TB,),
        in_specs=[
            pl.BlockSpec((TB, I), lambda i: (i, 0)),   # row tile of input
            pl.BlockSpec((I, Hp), lambda i: (0, 0)),   # full weight (VMEM-resident)
            pl.BlockSpec((1, Hp), lambda i: (0, 0)),   # full bias
        ],
        out_specs=pl.BlockSpec((TB, Hp), lambda i: (i, 0)),
        compiler_params=pltpu.CompilerParams(dimension_semantics=("parallel",)),
        cost_estimate=cost,
    )(x_pad, w_pad, b_pad)

    out = out[:B, :H]
    if squeeze:
        out = out[0]
    return out


class FNNCognoisePallas:
    """Mirrors abm/NN/memory.py::FNN_cognoise (nn.Linear + activation, noise is dead code)."""

    def __init__(self, arch, activ='relu', key=jax.random.PRNGKey(42)):
        input_size, hidden_size = arch
        if activ not in ('relu', 'tanh', 'silu', 'gelu'):
            raise ValueError(f'Invalid activation function: {activ}')
        self.input_size = input_size
        self.hidden_size = hidden_size
        self.activ = activ
        self.noise = 0.01
        # nn.Linear default init: uniform(-1/sqrt(in_features), 1/sqrt(in_features))
        k = 1.0 / math.sqrt(input_size)
        kw, kb = jax.random.split(key)
        self.weight = jax.random.uniform(kw, (hidden_size, input_size), jnp.float32, -k, k)
        self.bias = jax.random.uniform(kb, (hidden_size,), jnp.float32, -k, k)

    def __call__(self, state, hidden_null=None):
        # TODO(synk): the original forward computes `state + noise*randn_like(state)` but
        # immediately overwrites it with i2h(state); the noise is dead code, so no PRNG
        # noise is materialized here (output semantics are identical).
        x = fnn_forward(state, self.weight, self.bias, self.activ)
        return x, hidden_null


def fnn_reference(state, weight, bias, activ):
    """Pure-JAX reference matching the PyTorch forward's effective math."""
    y = state @ weight.T + bias
    return _apply_activ(activ, y)


if __name__ == "__main__":
    I, H, B = 16, 32, 8
    key = jax.random.PRNGKey(0)
    k_state, k_model = jax.random.split(key)
    state = jax.random.normal(k_state, (B, I), jnp.float32)

    model = FNNCognoisePallas(arch=(I, H), activ='relu', key=k_model)

    # Batched call (hidden_null passes straight through).
    y, hidden_null = model(state, None)
    jax.block_until_ready(y)

    y_ref = fnn_reference(state, model.weight, model.bias, 'relu')
    assert y.shape == (B, H)
    assert hidden_null is None
    assert jnp.allclose(y, y_ref, atol=1e-5, rtol=1e-5)

    # Unbatched (1-D state) call, as the ABM code typically uses.
    y1, _ = model(state[0], None)
    jax.block_until_ready(y1)
    assert y1.shape == (H,)
    assert jnp.allclose(y1, y_ref[0], atol=1e-5, rtol=1e-5)

    # Exercise a transcendental activation path too (EUP).
    model_t = FNNCognoisePallas(arch=(I, H), activ='tanh', key=k_model)
    yt, _ = model_t(state, None)
    jax.block_until_ready(yt)
    yt_ref = fnn_reference(state, model_t.weight, model_t.bias, 'tanh')
    assert jnp.allclose(yt, yt_ref, atol=1e-5, rtol=1e-5)

    print("KERNEL_OK")
</pallas_src>

<mosaic_0001>
module attributes {stable_mosaic.version = 11 : i64} {
  func.func @fnn_kernel(%arg0: i32, %arg1: memref<8x16xf32, #tpu.memory_space<vmem>>, %arg2: memref<16x128xf32, #tpu.memory_space<vmem>>, %arg3: memref<1x128xf32, #tpu.memory_space<vmem>>, %arg4: memref<8x128xf32, #tpu.memory_space<vmem>>) attributes {dimension_semantics = [#tpu.dimension_semantics<parallel>], iteration_bounds = array<i64: 1>, scalar_prefetch = 0 : i64, scratch_operands = 0 : i64, tpu.core_type = #tpu.core_type<tc>, window_params = [{transform_indices = @transform_0, window_bounds = array<i64: 8, 16>}, {pipeline_mode = #tpu.pipeline_mode<synchronous>, transform_indices = @transform_1, window_bounds = array<i64: 16, 128>}, {pipeline_mode = #tpu.pipeline_mode<synchronous>, transform_indices = @transform_2, window_bounds = array<i64: 1, 128>}, {transform_indices = @transform_3, window_bounds = array<i64: 8, 128>}]} {
    %c0 = arith.constant 0 : index
    %c0_0 = arith.constant 0 : index
    %0 = vector.load %arg1[%c0, %c0_0] : memref<8x16xf32, #tpu.memory_space<vmem>>, vector<8x16xf32>
    %c0_1 = arith.constant 0 : index
    %c0_2 = arith.constant 0 : index
    %1 = vector.load %arg2[%c0_1, %c0_2] : memref<16x128xf32, #tpu.memory_space<vmem>>, vector<16x128xf32>
    %cst = arith.constant dense<0.000000e+00> : vector<8x128xf32>
    %2 = tpu.matmul %0, %1, %cst {dimension_numbers = #tpu.dot_dimension_numbers<[1], [0], [0], [1], [0, 0, 1, 1], [], []>} : vector<8x16xf32>, vector<16x128xf32>, vector<8x128xf32> -> vector<8x128xf32>
    %c0_3 = arith.constant 0 : index
    %c0_4 = arith.constant 0 : index
    %3 = vector.load %arg3[%c0_3, %c0_4] : memref<1x128xf32, #tpu.memory_space<vmem>>, vector<1x128xf32>
    %4 = vector.broadcast %3 : vector<1x128xf32> to vector<8x128xf32>
    %5 = arith.addf %2, %4 : vector<8x128xf32>
    %cst_5 = arith.constant 0.000000e+00 : f32
    %6 = vector.broadcast %cst_5 : f32 to vector<8x128xf32>
    %7 = arith.maximumf %5, %6 : vector<8x128xf32>
    %c0_6 = arith.constant 0 : index
    %c0_7 = arith.constant 0 : index
    %8 = vector.load %arg4[%c0_6, %c0_7] : memref<8x128xf32, #tpu.memory_space<vmem>>, vector<8x128xf32>
    tpu.vector_store %arg4[%c0_6, %c0_7], %7 {strides = array<i32>} : memref<8x128xf32, #tpu.memory_space<vmem>>, vector<8x128xf32>,
    return
  }
  func.func @transform_0(%arg0: i32) -> (i32, i32) {
    %c0_i32 = arith.constant 0 : i32
    %c0_i32_0 = arith.constant 0 : i32
    return %arg0, %c0_i32 : i32, i32
  }
  func.func @transform_1(%arg0: i32) -> (i32, i32) {
    %c0_i32 = arith.constant 0 : i32
    %c0_i32_0 = arith.constant 0 : i32
    %c0_i32_1 = arith.constant 0 : i32
    return %c0_i32, %c0_i32_0 : i32, i32
  }
  func.func @transform_2(%arg0: i32) -> (i32, i32) {
    %c0_i32 = arith.constant 0 : i32
    %c0_i32_0 = arith.constant 0 : i32
    %c0_i32_1 = arith.constant 0 : i32
    return %c0_i32, %c0_i32_0 : i32, i32
  }
  func.func @transform_3(%arg0: i32) -> (i32, i32) {
    %c0_i32 = arith.constant 0 : i32
    %c0_i32_0 = arith.constant 0 : i32
    return %arg0, %c0_i32 : i32, i32
  }
}

</mosaic_0001>

<bundles_post_ra>
// kernel: tpu_custom_call.1
= control target key start
LH: loop header
LB: loop body
LE: loop exit
PB: predicated region body
PF: predicated region fallthrough
CT: control target
= control target key end

     0   :  { %8 = vsyncpa [#allocation3], 0  ;;  %s267_s0 = inlined_call_operand.hbm [shape: f32[8,16], index: 0, kind: input, shape index: {}]   ;;  %s268_s1 = inlined_call_operand.hbm [shape: f32[16,128], index: 1, kind: input, shape index: {}]   ;;  %s269_s2 = inlined_call_operand.vmem [shape: f32[1,128], index: 2, kind: input, shape index: {}]   ;;  %s270_s3 = inlined_call_operand.hbm [shape: f32[8,128], index: 3, kind: output, shape index: {}]  }
   0x1   :  { %9 = vsyncpa [#allocation6], 0 }
   0x2   :  { %10 = vsyncpa [#allocation4], 0  ;;  %s228_s12 = smov [#allocation2]   ;;  %s229_s14 = smov [#allocation5]  }
   0x3   :  { %s17_s13 = sshll.u32 %s228_s12, 4  ;;  %s26_s15 = sshll.u32 %s229_s14, 4  ;;  %s18_s13 = int_to_ptr.vmem [resolvable:$true] %s17_s13  ;;  %s27_s15 = int_to_ptr.vmem [resolvable:$true] %s26_s15 }
   0x4   :  { %s170_s16 = scalar_lea.vmem %s18_s13, 128  ;;  %p175_p1 = scmp.lt.s32.totalorder %s18_s13, %s18_s13 }
   0x5   :  { %p171_p0 = scmp.ne.s32.totalorder %s18_s13, %s170_s16  ;;  %p176_p2 = scmp.lt.s32.totalorder %s170_s16, %s170_s16 }
   0x7   :  { %p177_p3 = por %p176_p2, %p175_p1 }
   0x9   :  { %p178_p4 = pnand %p177_p3, %p171_p0 }
   0xb   :  { %181 = shalt.err (!%p178_p4)
}
   0xc   :  { %20 = dma.hbm_to_vmem [thread:$0]  %s267_s0, 128, %s18_s13, [#allocation3]  }
   0xd   :  { %s190_s19 = scalar_lea.vmem %s27_s15, 256  ;;  %p195_p6 = scmp.lt.s32.totalorder %s27_s15, %s27_s15 }
   0xe   :  { %p191_p5 = scmp.ne.s32.totalorder %s27_s15, %s190_s19  ;;  %p196_p7 = scmp.lt.s32.totalorder %s190_s19, %s190_s19 }
  0x10   :  { %p197_p8 = por %p196_p7, %p195_p6 }
  0x12   :  { %p198_p9 = pnand %p197_p8, %p191_p5 }
  0x14   :  { %201 = shalt.err (!%p198_p9)
}
  0x15   :  { %s230_s20 = smov 128   ;;  %s231_s21 = smov 8  }
  0x16   :  { %32 = dma.hbm_to_vmem [thread:$0]  %s268_s1, 256, %s27_s15, [#allocation6], %s230_s20, %s230_s20, %s231_s21  }
  0x17   :  { %222 = dma.done.wait [#allocation3], 128  }
  0x18   :  { %223 = vsyncadd [#allocation3], 4294967168 }
  0x19   :  { %224 = dma.done.wait [#allocation6], 256  }
  0x1a   :  { %225 = vsyncadd [#allocation6], 4294967040  ;;  %v232_v0 = vmov 0.0   ;;  %vm233_vm0 = vmmov 0   ;;  %v43_v1 = vld [vmem:[#allocation5 + $0x8] sm:$0xff]  ;;  %v42_v2 = vld [vmem:[#allocation5] sm:$0xff] }
  0x1b   :  { %148 = vmatprep.subr.mxu0 %v232_v0  ;;  %152 = vmatprep.mubr.msk.f32.mxu0 %vm233_vm0, %v232_v0  ;;  %v41_v3 = vld [vmem:[#allocation2] sm:$0xff]  ;;  %vm51_vm1 = vcmask 130048   ;;  %s234_s1 = smov [#allocation7]  }
  0x1c   :  { %149 = vmatpush3.msra.mxu0 %v43_v1  ;;  %v143_v4 = vld [vmem:[%s269_s2] ss:$0 sm:$0xff]  ;;  %s133_s25 = sshll.u32 %s234_s1, 4  ;;  %s134_s25 = int_to_ptr.vmem [resolvable:$true] %s133_s25 }
  0x1d   :  { %150 = vmatprep.subr.mxu0 %v232_v0  ;;  %s202_s26 = scalar_lea.vmem %s134_s25, 128  ;;  %p207_p11 = scmp.lt.s32.totalorder %s134_s25, %s134_s25 }
  0x1e   :  { %151 = vmatpush3.msra.mxu0 %v42_v2  ;;  %p203_p10 = scmp.ne.s32.totalorder %s134_s25, %s202_s26  ;;  %p208_p12 = scmp.lt.s32.totalorder %s202_s26, %s202_s26 }
  0x1f   :  { %153 = vmatmul.mubr.msk.f32.vlgmr.msra.gmra.mxu0 %vm51_vm1, %v41_v3 }
  0x20   :  { %p209_p13 = por %p208_p12, %p207_p11 }
  0x22   :  { %p210_p0 = pnand %p209_p13, %p203_p10 }
  0xdf   :  { %v121_v5 = vpop.f32.mrf.mxu0 }
  0xe0   :  { %v122_v6 = vadd.f32 %v143_v4, %v121_v5 }
  0xe1   :  { %v154_v7 = vpop.f32.mrf.mxu0 }
  0xe2   :  { %v125_v8 = vmax.f32 %v122_v6, 0.0 }
  0xe4   :  { %126 = vst [vmem:[#allocation7] sm:$0xff] %v125_v8 }
  0xe5   :  { %213 = shalt.err (!%p210_p0)
}
  0xe6   :  { %136 = dma.vmem_to_hbm [thread:$0]  %s134_s25, 128, %s270_s3, [#allocation4]  }
  0xe7   :  { %226 = dma.done.wait [#allocation4], 128  }
  0xe8   :  { %227 = vsyncadd [#allocation4], 4294967168 }
  0xe9   :  { %140 = vsyncpa [#allocation3], 1 }
  0xea   :  { %141 = vsyncpa [#allocation6], 1 }
  0xeb   :  { %142 = vsyncpa [#allocation4], 1 }

</bundles_post_ra>
